<compile_context>
chip_gen: v7x
topology: tpu7x:2x2x1
jax: 0.10.0
libtpu: 0.0.40
codegen_flags: <defaults>
</compile_context>

<pallas_src>
import jax
import jax.numpy as jnp
from jax.experimental import pallas as pl
from jax.experimental.pallas import tpu as pltpu


def _round_up(n: int, m: int) -> int:
    return ((n + m - 1) // m) * m


def _round_down(n: int, m: int) -> int:
    return (n // m) * m


def _choose_tiles(B: int, I: int, D: int, itemsize: int, max_tile_bytes: int):
    # Feature tile (lane axis): never pad D; only *tile* it when it is large.
    TD = 512 if D > 512 else D

    # Batch tile (sublane axis of the output block): multiple of 8, or full B
    # when B < 8.  Aim for >= 2 batch blocks so v7x's two TensorCores both get
    # work on a "parallel" axis.
    if B <= 8:
        TB = B
    else:
        TB = min(128, max(8, _round_down(B // 2, 8)))

    # Wide-D guard: even the minimum seq tile must fit the per-buffer budget.
    min_ti = I if I <= 8 else 8
    while B > 8 and TB > 8 and TB * min_ti * TD * itemsize > max_tile_bytes:
        TB = max(8, _round_down(TB // 2, 8))

    # Seq (reduction) tile: full I when it fits the budget (no mask needed),
    # otherwise the largest multiple of 8 that fits max_tile_bytes.
    if I <= 8:
        TI = I
    else:
        budget_rows = max(8, _round_down(max_tile_bytes // (TB * TD * itemsize), 8))
        TI = I if I <= budget_rows else budget_rows

    return TB, TI, TD


def learned_pooling(x: jax.Array, weights: jax.Array,
                    *, max_tile_bytes: int = 16 * 1024 * 1024) -> jax.Array:
    """x: (B, I, D); weights: (D,) raw parameter (softmax applied here, once, in f32)."""
    B, I, D = x.shape
    itemsize = jnp.dtype(x.dtype).itemsize

    # Softmax over the raw parameter, computed once in f32 (hoisted out of the kernel).
    w = jax.nn.softmax(weights.astype(jnp.float32), axis=-1).reshape(1, D)

    TB, TI, TD = _choose_tiles(B, I, D, itemsize, max_tile_bytes)
    nb, nd, nk = pl.cdiv(B, TB), pl.cdiv(D, TD), pl.cdiv(I, TI)
    needs_i_mask = (I % TI) != 0          # static: only the last k block is ragged
    last_rem = I - (nk - 1) * TI          # static valid-row count of the last k block

    def kernel(x_ref, w_ref, o_ref, acc_ref):
        # x_ref:   (TB, TI, TD) input block
        # w_ref:   (1, TD)      softmax-normalized weights (f32)
        # o_ref:   (TB, TD)     output block (same block index across the k axis)
        # acc_ref: (TB, TD)     f32 accumulator, persists across grid steps
        k = pl.program_id(2)

        @pl.when(k == 0)
        def _():
            acc_ref[...] = jnp.zeros_like(acc_ref)

        if needs_i_mask:
            # Full blocks: reduce everything.
            @pl.when(k < nk - 1)
            def _():
                acc_ref[...] += jnp.sum(x_ref[...], axis=1, dtype=jnp.float32)

            # Ragged last block: OOB rows are unspecified, so reduce only the
            # statically-known valid prefix (zero-cost static ref slice).
            @pl.when(k == nk - 1)
            def _():
                acc_ref[...] += jnp.sum(x_ref[:, :last_rem, :], axis=1,
                                        dtype=jnp.float32)
        else:
            acc_ref[...] += jnp.sum(x_ref[...], axis=1, dtype=jnp.float32)

        @pl.when(k == nk - 1)
        def _():
            o_ref[...] = (acc_ref[...] * w_ref[...]).astype(o_ref.dtype)

    # ---- VMEM budget / compiler params ---------------------------------------
    x_tile = TB * TI * TD * itemsize
    out_tile = TB * TD * itemsize
    w_tile = TD * 4
    acc_bytes = TB * TD * 4
    vmem_needed = 2 * (x_tile + out_tile + w_tile) + acc_bytes
    try:
        phys_vmem = getattr(pltpu.get_tpu_info(), "vmem_capacity_bytes", 64 * 1024 * 1024)
    except Exception:
        phys_vmem = 64 * 1024 * 1024      # conservative v7x-sized fallback
    vmem_limit = int(min(int(phys_vmem * 0.85),
                         max(32 * 1024 * 1024, vmem_needed + (12 << 20))))
    vmem_limit = max(vmem_limit, vmem_needed + (2 << 20))

    cost = pl.CostEstimate(
        flops=B * I * D + B * D,
        transcendentals=0,
        bytes_accessed=B * I * D * itemsize + B * D * itemsize + D * 4,
    )

    out = pl.pallas_call(
        kernel,
        out_shape=jax.ShapeDtypeStruct((B, D), x.dtype),
        grid_spec=pltpu.PrefetchScalarGridSpec(
            num_scalar_prefetch=0,
            grid=(nb, nd, nk),
            in_specs=[
                pl.BlockSpec((TB, TI, TD), lambda b, d, k: (b, k, d)),  # x tile
                pl.BlockSpec((1, TD), lambda b, d, k: (0, d)),          # weights
            ],
            out_specs=pl.BlockSpec((TB, TD), lambda b, d, k: (b, d)),   # constant over k
            scratch_shapes=[pltpu.VMEM((TB, TD), jnp.float32)],         # f32 accumulator
        ),
        compiler_params=pltpu.CompilerParams(
            dimension_semantics=("parallel", "parallel", "arbitrary"),
            vmem_limit_bytes=vmem_limit,
        ),
        cost_estimate=cost,
    )(x, w)

    return out


def learned_pooling_ref(x, weights):
    w = jax.nn.softmax(weights.astype(jnp.float32), axis=-1).astype(x.dtype)
    return jnp.einsum("bid,d->bd", x, w)


if __name__ == "__main__":
    key = jax.random.PRNGKey(0)
    B, I, D = 2, 8, 32            # batch=2, seq=8, feature dim (input_dim)=32

    x = jax.random.normal(key, (B, I, D), dtype=jnp.float32)
    # Matches nn.Parameter(torch.ones(input_dim))
    weights = jnp.ones((D,), dtype=jnp.float32)

    out = jax.block_until_ready(learned_pooling(x, weights))
    ref = learned_pooling_ref(x, weights)
    assert out.shape == (B, D)
    assert jnp.allclose(out, ref, atol=1e-5, rtol=1e-5), "mismatch vs reference"

    # Small ragged-shape sanity check: exercises multi-step accumulation plus the
    # in-kernel tail mask (no wrapper-side padding anywhere).
    x2 = jax.random.normal(jax.random.PRNGKey(1), (5, 37, 40), dtype=jnp.float32)
    w2 = jax.random.normal(jax.random.PRNGKey(2), (40,), dtype=jnp.float32)
    out2 = jax.block_until_ready(learned_pooling(x2, w2, max_tile_bytes=4096))
    ref2 = learned_pooling_ref(x2, w2)
    assert out2.shape == (5, 40)
    assert jnp.allclose(out2, ref2, atol=1e-5, rtol=1e-5), "ragged mismatch vs reference"

    print("KERNEL_OK")
</pallas_src>

<mosaic_0001>
module attributes {stable_mosaic.version = 11 : i64} {
  func.func @kernel(%arg0: i32, %arg1: i32, %arg2: i32, %arg3: memref<2x8x32xf32, #tpu.memory_space<vmem>>, %arg4: memref<1x32xf32, #tpu.memory_space<vmem>>, %arg5: memref<2x32xf32, #tpu.memory_space<vmem>>, %arg6: memref<2x32xf32, #tpu.memory_space<vmem>>) attributes {dimension_semantics = [#tpu.dimension_semantics<parallel>, #tpu.dimension_semantics<parallel>, #tpu.dimension_semantics<arbitrary>], iteration_bounds = array<i64: 1, 1, 1>, scalar_prefetch = 0 : i64, scratch_operands = 1 : i64, tpu.core_type = #tpu.core_type<tc>, window_params = [{transform_indices = @transform_0, window_bounds = array<i64: 2, 8, 32>}, {transform_indices = @transform_1, window_bounds = array<i64: 1, 32>}, {transform_indices = @transform_2, window_bounds = array<i64: 2, 32>}]} {
    %c0_i32 = arith.constant 0 : i32
    %0 = arith.cmpi eq, %arg2, %c0_i32 : i32
    %1 = arith.extui %0 : i1 to i32
    %c0_i32_0 = arith.constant 0 : i32
    %2 = arith.cmpi ne, %1, %c0_i32_0 : i32
    scf.if %2 {
      %cst_9 = arith.constant 0.000000e+00 : f32
      %11 = vector.broadcast %cst_9 : f32 to vector<2x32xf32>
      %c0_10 = arith.constant 0 : index
      %c0_11 = arith.constant 0 : index
      %12 = vector.load %arg6[%c0_10, %c0_11] : memref<2x32xf32, #tpu.memory_space<vmem>>, vector<2x32xf32>
      tpu.vector_store %arg6[%c0_10, %c0_11], %11 {strides = array<i32>} : memref<2x32xf32, #tpu.memory_space<vmem>>, vector<2x32xf32>,
    } else {
    }
    %c0 = arith.constant 0 : index
    %c0_1 = arith.constant 0 : index
    %3 = vector.load %arg6[%c0, %c0_1] : memref<2x32xf32, #tpu.memory_space<vmem>>, vector<2x32xf32>
    %c0_2 = arith.constant 0 : index
    %c0_3 = arith.constant 0 : index
    %c0_4 = arith.constant 0 : index
    %4 = vector.load %arg3[%c0_2, %c0_3, %c0_4] : memref<2x8x32xf32, #tpu.memory_space<vmem>>, vector<2x8x32xf32>
    %cst = arith.constant dense<0.000000e+00> : vector<2x32xf32>
    %5 = vector.multi_reduction <add>, %4, %cst [1] : vector<2x8x32xf32> to vector<2x32xf32>
    %6 = arith.addf %3, %5 : vector<2x32xf32>
    %c0_5 = arith.constant 0 : index
    %c0_6 = arith.constant 0 : index
    %7 = vector.load %arg6[%c0_5, %c0_6] : memref<2x32xf32, #tpu.memory_space<vmem>>, vector<2x32xf32>
    tpu.vector_store %arg6[%c0_5, %c0_6], %6 {strides = array<i32>} : memref<2x32xf32, #tpu.memory_space<vmem>>, vector<2x32xf32>,
    %c0_i32_7 = arith.constant 0 : i32
    %8 = arith.cmpi eq, %arg2, %c0_i32_7 : i32
    %9 = arith.extui %8 : i1 to i32
    %c0_i32_8 = arith.constant 0 : i32
    %10 = arith.cmpi ne, %9, %c0_i32_8 : i32
    scf.if %10 {
      %c0_9 = arith.constant 0 : index
      %c0_10 = arith.constant 0 : index
      %11 = vector.load %arg6[%c0_9, %c0_10] : memref<2x32xf32, #tpu.memory_space<vmem>>, vector<2x32xf32>
      %c0_11 = arith.constant 0 : index
      %c0_12 = arith.constant 0 : index
      %12 = vector.load %arg4[%c0_11, %c0_12] : memref<1x32xf32, #tpu.memory_space<vmem>>, vector<1x32xf32>
      %13 = vector.broadcast %12 : vector<1x32xf32> to vector<2x32xf32>
      %14 = arith.mulf %11, %13 : vector<2x32xf32>
      %c0_13 = arith.constant 0 : index
      %c0_14 = arith.constant 0 : index
      %15 = vector.load %arg5[%c0_13, %c0_14] : memref<2x32xf32, #tpu.memory_space<vmem>>, vector<2x32xf32>
      tpu.vector_store %arg5[%c0_13, %c0_14], %14 {strides = array<i32>} : memref<2x32xf32, #tpu.memory_space<vmem>>, vector<2x32xf32>,
    } else {
    }
    return
  }
  func.func @transform_0(%arg0: i32, %arg1: i32, %arg2: i32) -> (i32, i32, i32) {
    %c0_i32 = arith.constant 0 : i32
    return %arg0, %arg2, %arg1 : i32, i32, i32
  }
  func.func @transform_1(%arg0: i32, %arg1: i32, %arg2: i32) -> (i32, i32) {
    %c0_i32 = arith.constant 0 : i32
    %c0_i32_0 = arith.constant 0 : i32
    return %c0_i32, %arg1 : i32, i32
  }
  func.func @transform_2(%arg0: i32, %arg1: i32, %arg2: i32) -> (i32, i32) {
    %c0_i32 = arith.constant 0 : i32
    return %arg0, %arg1 : i32, i32
  }
}

</mosaic_0001>

<bundles_post_ra>
// kernel: tpu_custom_call.1
= control target key start
LH: loop header
LB: loop body
LE: loop exit
PB: predicated region body
PF: predicated region fallthrough
CT: control target
= control target key end

     0   :  { %7 = vsyncpa [#allocation4], 0  ;;  %s190_s0 = inlined_call_operand.hbm [shape: f32[2,8,32], index: 0, kind: input, shape index: {}]   ;;  %s191_s1 = inlined_call_operand.vmem [shape: f32[1,32], index: 1, kind: input, shape index: {}]   ;;  %s192_s2 = inlined_call_operand.hbm [shape: f32[2,32], index: 2, kind: output, shape index: {}]  }
   0x1   :  { %8 = vsyncpa [#allocation5], 0  ;;  %s140_s9 = smov [#allocation3]   ;;  %s92_s13 = scalar_lea.hbm %s190_s0, 256 }
   0x2   :  { %s14_s10 = sshll.u32 %s140_s9, 4  ;;  %p93_p0 = scmp.ne.s32.totalorder %s190_s0, %s92_s13  ;;  %s15_s10 = int_to_ptr.vmem [resolvable:$true] %s14_s10 }
   0x3   :  { %p96_p1 = scmp.lt.u32.totalorder %s92_s13, %s190_s0 }
   0x5   :  { %p98_p2 = pnand %p96_p1, %p93_p0 }
   0x7   :  { %101 = shalt.err (!%p98_p2)
}
   0x8   :  { %s102_s18 = scalar_lea.vmem %s15_s10, 256  ;;  %p107_p4 = scmp.lt.s32.totalorder %s15_s10, %s15_s10 }
   0x9   :  { %p103_p3 = scmp.ne.s32.totalorder %s15_s10, %s102_s18  ;;  %p108_p5 = scmp.lt.s32.totalorder %s102_s18, %s102_s18 }
   0xb   :  { %p109_p6 = por %p108_p5, %p107_p4 }
   0xd   :  { %p110_p7 = pnand %p109_p6, %p103_p3 }
   0xf   :  { %113 = shalt.err (!%p110_p7)
}
  0x10   :  { %s141_s19 = smov 128   ;;  %s142_s20 = smov 8  }
  0x11   :  { %20 = dma.hbm_to_vmem [thread:$0]  %s190_s0, 256, %s15_s10, [#allocation4], %s141_s19, %s141_s19, %s142_s20  }
  0x12   :  { %136 = dma.done.wait [#allocation4], 256  }
  0x13   :  { %137 = vsyncadd [#allocation4], 4294967040  ;;  %vm30_vm0 = vcmask 254976   ;;  %v143_v0 = vmov 0.0   ;;  %vm35_vm1 = vcmask 261120   ;;  %v33_v1 = vld [vmem:[#allocation3] sm:$0xff] }
  0x14   :  { %31 = vst.msk [vmem:[#allocation2] sm:$0x3] %vm30_vm0, %v143_v0  ;;  %v34_v2 = vld [vmem:[#allocation3 + $0x8] sm:$0xff]  ;;  %v36_v3 = vsel %vm35_vm1, %v33_v1, 0.0  ;;  %vm52_vm2 = vcmask 1041409   ;;  %s144_s24 = smov [#allocation6]  }
  0x15   :  { %v43_v4 = vsel %vm35_vm1, %v34_v2, 0.0  ;;  %v37_v5 = vrot.slane %v36_v3, 4  ;;  %v86_v20 = vld [vmem:[%s191_s1] ss:$0 sm:$0xff]  ;;  %s77_s25 = sshll.u32 %s144_s24, 4  ;;  %s78_s25 = int_to_ptr.vmem [resolvable:$true] %s77_s25 }
  0x16   :  { %v44_v6 = vrot.slane %v43_v4, 4  ;;  %s114_s26 = scalar_lea.vmem %s78_s25, 32  ;;  %p119_p9 = scmp.lt.s32.totalorder %s78_s25, %s78_s25 }
  0x17   :  { %v38_v7 = vadd.f32 %v37_v5, %v36_v3  ;;  %p115_p8 = scmp.ne.s32.totalorder %s78_s25, %s114_s26  ;;  %p120_p10 = scmp.lt.s32.totalorder %s114_s26, %s114_s26 }
  0x18   :  { %v45_v8 = vadd.f32 %v44_v6, %v43_v4 }
  0x19   :  { %v39_v9 = vrot.slane %v38_v7, 2  ;;  %p121_p11 = por %p120_p10, %p119_p9 }
  0x1a   :  { %v46_v10 = vrot.slane %v45_v8, 2 }
  0x1b   :  { %v40_v11 = vadd.f32 %v39_v9, %v38_v7  ;;  %v32_v15 = vld [vmem:[#allocation2] sm:$0x3]  ;;  %p122_p12 = pnand %p121_p11, %p115_p8 }
  0x1c   :  { %v47_v12 = vadd.f32 %v46_v10, %v45_v8 }
  0x1d   :  { %v41_v13 = vrot.slane %v40_v11, 1 }
  0x1e   :  { %v48_v14 = vrot.slane %v47_v12, 1 }
  0x1f   :  { %v42_v16 = vadd.f32 %v41_v13, %v40_v11 }
  0x20   :  { %v49_v17 = vadd.f32 %v48_v14, %v47_v12 }
  0x22   :  { %v53_v18 = vsel %vm52_vm2, %v49_v17, %v42_v16 }
  0x23   :  { %v55_v19 = vadd.f32 %v53_v18, %v32_v15 }
  0x25   :  { %57 = vst.msk [vmem:[#allocation2] sm:$0x3] %vm30_vm0, %v55_v19 }
  0x2c   :  { %v61_v21 = vld [vmem:[#allocation2] sm:$0x3] }
  0x2d   :  { %v69_v22 = vmul.f32 %v86_v20, %v61_v21 }
  0x2f   :  { %70 = vst.msk [vmem:[#allocation6] sm:$0x3] %vm30_vm0, %v69_v22 }
  0x30   :  { %125 = shalt.err (!%p122_p12)
}
  0x31   :  { %s126_s29 = scalar_lea.hbm %s192_s2, 32 }
  0x32   :  { %p127_p13 = scmp.ne.s32.totalorder %s192_s2, %s126_s29  ;;  %p130_p0 = scmp.lt.u32.totalorder %s126_s29, %s192_s2 }
  0x34   :  { %p132_p1 = pnand %p130_p0, %p127_p13 }
  0x36   :  { %135 = shalt.err (!%p132_p1)
}
  0x37   :  { %80 = dma.vmem_to_hbm [thread:$0]  %s78_s25, 32, %s192_s2, [#allocation5]  }
  0x38   :  { %138 = dma.done.wait [#allocation5], 32  }
  0x39   :  { %139 = vsyncadd [#allocation5], 4294967264 }
  0x3a   :  { %84 = vsyncpa [#allocation4], 1 }
  0x3b   :  { %85 = vsyncpa [#allocation5], 1 }

</bundles_post_ra>
